<compile_context>
chip_gen: v6e
topology: v6e:2x2x1
jax: 0.10.0
libtpu: 0.0.40
codegen_flags: <defaults>
</compile_context>

<pallas_src>
import math
import string

import jax
import jax.numpy as jnp
from jax.experimental import pallas as pl
from jax.experimental.pallas import tpu as pltpu


# ---------------------------------------------------------------------------
# Pallas kernel: one (tm, tn) tile of  y = x @ W + b, f32 accumulator.
# W is pre-transposed to (K, N) in the wrapper: K on sublanes, N on lanes.
# ---------------------------------------------------------------------------
def _linear_bias_kernel(x_ref, w_ref, b_ref, o_ref, acc_ref):
    k = pl.program_id(2)

    @pl.when(k == 0)
    def _():
        acc_ref[...] = jnp.zeros_like(acc_ref)

    acc_ref[...] += jnp.dot(x_ref[...], w_ref[...],
                            preferred_element_type=jnp.float32)

    @pl.when(k == pl.num_programs(2) - 1)
    def _():
        o_ref[...] = (acc_ref[...] + b_ref[...].astype(jnp.float32)).astype(o_ref.dtype)


# ---------------------------------------------------------------------------
# Helpers.
# ---------------------------------------------------------------------------
def _round_up(v, m):
    return ((v + m - 1) // m) * m


def _round_down(v, m):
    return (v // m) * m


def _linear_pallas(x2d, w_t, bias_row, out_dtype, *,
                   block_m, block_n, block_k, vmem_budget_bytes):
    """x2d: (M_pad, K_pad); w_t: (K_pad, N_pad); bias_row: (1, N_pad). Pre-padded."""
    m_pad, k_pad = x2d.shape
    n_pad = w_t.shape[1]

    in_itemsize = jnp.dtype(x2d.dtype).itemsize
    b_itemsize = jnp.dtype(bias_row.dtype).itemsize
    out_itemsize = jnp.dtype(out_dtype).itemsize
    m_align = 16 if in_itemsize < 4 else 8

    def vmem_need(tm, tk, tn):
        # double-buffered x / W / bias / out tiles + f32 accumulator scratch
        return (2 * (tm * tk + tk * tn) * in_itemsize
                + 2 * tn * b_itemsize
                + 2 * tm * tn * out_itemsize
                + tm * tn * 4)

    def divisor_tk(cap):
        # largest multiple of 128 <= cap that divides k_pad (k_pad is 128-aligned)
        cap = max(128, _round_down(min(cap, k_pad), 128))
        while k_pad % cap != 0:
            cap -= 128
        return cap

    tm = max(m_align, _round_down(min(block_m, m_pad), m_align))
    tn = max(128, _round_down(min(block_n, n_pad), 128))
    tk = divisor_tk(block_k)

    # Weight-resident fast path: whole adapted W as a single block (fetched once,
    # reused across every M tile). Otherwise shrink tiles into the VMEM budget,
    # keeping tk (reduction depth per step) as large as possible.
    if vmem_need(tm, k_pad, n_pad) <= vmem_budget_bytes:
        tk, tn = k_pad, n_pad
    else:
        while vmem_need(tm, tk, tn) > vmem_budget_bytes:
            if tn > 256:
                tn = _round_up(tn // 2, 128)
            elif tm > 4 * m_align:
                tm = max(m_align, _round_down(tm // 2, m_align))
            elif tk > 512:
                tk = divisor_tk(tk // 2)
            else:
                break  # already tiny; let the compiler cope

    # Megacore (2 TCs on v7x): make sure the parallel axes expose >= 2 tiles.
    if (pl.cdiv(m_pad, tm) * pl.cdiv(n_pad, tn) < 2) and n_pad >= 256:
        tn = _round_up(pl.cdiv(n_pad, 2), 128)

    m_tiles = pl.cdiv(m_pad, tm)
    n_tiles = pl.cdiv(n_pad, tn)
    k_tiles = k_pad // tk
    grid = (m_tiles, n_tiles, k_tiles)

    x_restream = n_tiles if k_tiles > 1 else 1
    cost = pl.CostEstimate(
        flops=2 * m_pad * n_pad * k_pad,
        transcendentals=0,
        bytes_accessed=(x_restream * m_pad * k_pad * in_itemsize
                        + m_tiles * k_pad * n_pad * in_itemsize
                        + n_pad * b_itemsize
                        + m_pad * n_pad * out_itemsize),
    )

    need = vmem_need(tm, tk, tn)
    vmem_limit = min(64 << 20, max(32 << 20, need * 5 // 4 + (2 << 20)))

    return pl.pallas_call(
        _linear_bias_kernel,
        out_shape=jax.ShapeDtypeStruct((m_pad, n_pad), out_dtype),
        grid_spec=pltpu.PrefetchScalarGridSpec(
            num_scalar_prefetch=0,
            grid=grid,
            in_specs=[
                pl.BlockSpec((tm, tk), lambda i, j, k: (i, k)),   # x tile
                pl.BlockSpec((tk, tn), lambda i, j, k: (k, j)),   # W^T tile (K, N)
                pl.BlockSpec((1, tn), lambda i, j, k: (0, j)),    # bias tile
            ],
            out_specs=pl.BlockSpec((tm, tn), lambda i, j, k: (i, j)),
            scratch_shapes=[pltpu.VMEM((tm, tn), jnp.float32)],
        ),
        compiler_params=pltpu.CompilerParams(
            dimension_semantics=("parallel", "parallel", "arbitrary"),
            vmem_limit_bytes=vmem_limit,
        ),
        cost_estimate=cost,
    )(x2d, w_t, bias_row)


# ---------------------------------------------------------------------------
# TT weight reconstruction (tiny glue, plain JAX) + forward wrapper.
# ---------------------------------------------------------------------------
def tt_contract(cores):
    """Generic TT contraction. cores[i]: (r_i, n_i, r_{i+1}).
    Matches the torch einsums ('ijk,klm,mno,opq->jlnp', 6/7/8/10/12-core forms)."""
    letters = string.ascii_lowercase
    assert 2 * len(cores) + 1 <= len(letters), "too many TT cores"
    terms, out = [], []
    for i in range(len(cores)):
        a, b, c = letters[2 * i], letters[2 * i + 1], letters[2 * i + 2]
        terms.append(a + b + c)
        out.append(b)
    return jnp.einsum(",".join(terms) + "->" + "".join(out), *cores)


def lora_tt_linear(x, weight, bias, tt_cores, alpha, *,
                   block_m=512, block_n=1024, block_k=2048,
                   compute_dtype=jnp.bfloat16,
                   vmem_budget_bytes=28 << 20):
    """Forward pass of LoRATTLinearWrapper.

    x:        (..., in_features)
    weight:   (out_features, in_features)   (PyTorch nn.Linear layout)
    bias:     (out_features,) or None
    tt_cores: list of (rank[i], tt_shape[i], rank[i+1]) arrays
    alpha:    scalar (static Python number or traced)
    """
    out_f, in_f = weight.shape
    lead = x.shape[:-1]
    out_dtype = x.dtype
    x2d = x.reshape(-1, in_f)
    m = x2d.shape[0]

    # --- fold TT delta + alpha into the weight ONCE (plain XLA, outside kernel) ---
    alpha_static = isinstance(alpha, (int, float))
    if (not alpha_static) or alpha > 0:
        # The torch module reshapes the contracted TT tensor to weight.shape
        # (its `in_features/out_features` attributes are the unpacked weight.shape).
        delta = tt_contract(tt_cores).reshape(out_f, in_f)
        adapted = weight + jnp.asarray(alpha, weight.dtype) * delta
    else:
        adapted = weight  # static alpha == 0: no zero-delta allocation / DMA

    # Pre-transpose to (in_f, out_f): kernel feeds the MXU a K-major RHS directly.
    w_t = adapted.T
    if compute_dtype is not None:
        x2d = x2d.astype(compute_dtype)
        w_t = w_t.astype(compute_dtype)

    if bias is None:
        bias_row = jnp.zeros((1, out_f), jnp.float32)
    else:
        bias_row = bias.reshape(1, out_f)

    # --- pad to TPU-friendly multiples; output sliced back afterwards -------------
    itemsize = jnp.dtype(x2d.dtype).itemsize
    m_align = 16 if itemsize < 4 else 8
    m_pad = _round_up(m, m_align)
    k_pad = _round_up(in_f, 128)
    n_pad = _round_up(out_f, 128)
    if m_pad != m or k_pad != in_f:
        x2d = jnp.pad(x2d, ((0, m_pad - m), (0, k_pad - in_f)))
    if k_pad != in_f or n_pad != out_f:
        w_t = jnp.pad(w_t, ((0, k_pad - in_f), (0, n_pad - out_f)))
    if n_pad != out_f:
        bias_row = jnp.pad(bias_row, ((0, 0), (0, n_pad - out_f)))

    y2d = _linear_pallas(x2d, w_t, bias_row, out_dtype,
                         block_m=block_m, block_n=block_n, block_k=block_k,
                         vmem_budget_bytes=vmem_budget_bytes)
    return y2d[:m, :out_f].reshape(*lead, out_f)


# ---------------------------------------------------------------------------
# Synthetic parameter init + reference + self-test.
# ---------------------------------------------------------------------------
def init_params(key, in_f, out_f, tt_shape, tt_rank):
    k_w, k_b, *k_cores = jax.random.split(key, 2 + len(tt_shape))
    bound = 1.0 / math.sqrt(in_f)
    weight = jax.random.uniform(k_w, (out_f, in_f), jnp.float32, -bound, bound)
    bias = jax.random.uniform(k_b, (out_f,), jnp.float32, -bound, bound)
    cores = []
    for i, kc in enumerate(k_cores):
        shape = (tt_rank[i], tt_shape[i], tt_rank[i + 1])
        std = 1.0 / math.sqrt(shape[1])                    # matches init_core
        cores.append(jax.random.normal(kc, shape, jnp.float32) * std)
    # TODO(synk): the torch __init__ re-seeds the cores with a TT-SVD
    # (tensor_train) of a kaiming-initialized W_delta; here the cores use the
    # init_core distribution directly (synthetic, no checkpoint in-script).
    return weight, bias, cores


def _ref_forward(x2d, weight, bias, cores, alpha):
    out_f, in_f = weight.shape
    if alpha > 0:
        w = weight + alpha * tt_contract(cores).reshape(out_f, in_f)
    else:
        w = weight
    return x2d @ w.T + bias


if __name__ == "__main__":
    key = jax.random.PRNGKey(0)

    # --- case 1: square layer (batch=2, seq=8, hidden=32), default bf16 path ----
    in_f, out_f = 32, 32
    tt_shape, tt_rank, alpha = (8, 4, 8, 4), (1, 4, 4, 4, 1), 8
    k_p, k_x, key = jax.random.split(key, 3)
    w1, b1, c1 = init_params(k_p, in_f, out_f, tt_shape, tt_rank)
    x1 = jax.random.normal(k_x, (2, 8, in_f), jnp.float32)

    y1 = jax.block_until_ready(lora_tt_linear(x1, w1, b1, c1, alpha))
    ref1 = _ref_forward(x1.reshape(-1, in_f), w1, b1, c1, alpha).reshape(2, 8, out_f)
    assert y1.shape == (2, 8, out_f)
    rel_err = jnp.max(jnp.abs(y1 - ref1)) / (jnp.max(jnp.abs(ref1)) + 1e-6)
    assert rel_err < 2e-2, f"bf16 path mismatch, rel_err={rel_err}"

    # same case in f32 compute: tight check
    y1f = jax.block_until_ready(
        lora_tt_linear(x1, w1, b1, c1, alpha, compute_dtype=jnp.float32))
    assert jnp.allclose(y1f, ref1, atol=1e-4, rtol=1e-4), "f32 path mismatch (square)"

    # --- case 2: non-square layer (verifies TT-delta reshape orientation) -------
    in_f2, out_f2 = 64, 32
    tt_shape2, tt_rank2, alpha2 = (4, 8, 8, 8), (1, 4, 4, 4, 1), 4
    k_p2, k_x2, key = jax.random.split(key, 3)
    w2, b2, c2 = init_params(k_p2, in_f2, out_f2, tt_shape2, tt_rank2)
    x2 = jax.random.normal(k_x2, (2, 8, in_f2), jnp.float32)

    y2 = jax.block_until_ready(
        lora_tt_linear(x2, w2, b2, c2, alpha2, compute_dtype=jnp.float32))
    ref2 = _ref_forward(x2.reshape(-1, in_f2), w2, b2, c2, alpha2).reshape(2, 8, out_f2)
    assert y2.shape == (2, 8, out_f2)
    assert jnp.allclose(y2, ref2, atol=1e-4, rtol=1e-4), "non-square mismatch"

    # --- case 3: alpha == 0 path (plain F.linear) --------------------------------
    y0 = jax.block_until_ready(
        lora_tt_linear(x1, w1, b1, c1, 0, compute_dtype=jnp.float32))
    assert jnp.allclose(y0, x1 @ w1.T + b1, atol=1e-4, rtol=1e-4), "alpha=0 mismatch"

    print("KERNEL_OK")
</pallas_src>

<mosaic_0001>
module attributes {stable_mosaic.version = 11 : i64} {
  func.func @_linear_bias_kernel(%arg0: i32, %arg1: i32, %arg2: i32, %arg3: memref<16x128xbf16, #tpu.memory_space<vmem>>, %arg4: memref<128x128xbf16, #tpu.memory_space<vmem>>, %arg5: memref<1x128xf32, #tpu.memory_space<vmem>>, %arg6: memref<16x128xf32, #tpu.memory_space<vmem>>, %arg7: memref<16x128xf32, #tpu.memory_space<vmem>>) attributes {dimension_semantics = [#tpu.dimension_semantics<parallel>, #tpu.dimension_semantics<parallel>, #tpu.dimension_semantics<arbitrary>], iteration_bounds = array<i64: 1, 1, 1>, scalar_prefetch = 0 : i64, scratch_operands = 1 : i64, tpu.core_type = #tpu.core_type<tc>, window_params = [{transform_indices = @transform_0, window_bounds = array<i64: 16, 128>}, {transform_indices = @transform_1, window_bounds = array<i64: 128, 128>}, {transform_indices = @transform_2, window_bounds = array<i64: 1, 128>}, {transform_indices = @transform_3, window_bounds = array<i64: 16, 128>}]} {
    %c0_i32 = arith.constant 0 : i32
    %0 = arith.cmpi eq, %arg2, %c0_i32 : i32
    %1 = arith.extui %0 : i1 to i32
    %c0_i32_0 = arith.constant 0 : i32
    %2 = arith.cmpi ne, %1, %c0_i32_0 : i32
    scf.if %2 {
      %cst_10 = arith.constant 0.000000e+00 : f32
      %12 = vector.broadcast %cst_10 : f32 to vector<16x128xf32>
      %c0_11 = arith.constant 0 : index
      %c0_12 = arith.constant 0 : index
      %13 = vector.load %arg7[%c0_11, %c0_12] : memref<16x128xf32, #tpu.memory_space<vmem>>, vector<16x128xf32>
      tpu.vector_store %arg7[%c0_11, %c0_12], %12 {strides = array<i32>} : memref<16x128xf32, #tpu.memory_space<vmem>>, vector<16x128xf32>,
    } else {
    }
    %c0 = arith.constant 0 : index
    %c0_1 = arith.constant 0 : index
    %3 = vector.load %arg7[%c0, %c0_1] : memref<16x128xf32, #tpu.memory_space<vmem>>, vector<16x128xf32>
    %c0_2 = arith.constant 0 : index
    %c0_3 = arith.constant 0 : index
    %4 = vector.load %arg3[%c0_2, %c0_3] : memref<16x128xbf16, #tpu.memory_space<vmem>>, vector<16x128xbf16>
    %c0_4 = arith.constant 0 : index
    %c0_5 = arith.constant 0 : index
    %5 = vector.load %arg4[%c0_4, %c0_5] : memref<128x128xbf16, #tpu.memory_space<vmem>>, vector<128x128xbf16>
    %cst = arith.constant dense<0.000000e+00> : vector<16x128xf32>
    %6 = tpu.matmul %4, %5, %cst {dimension_numbers = #tpu.dot_dimension_numbers<[1], [0], [0], [1], [0, 0, 1, 1], [], []>} : vector<16x128xbf16>, vector<128x128xbf16>, vector<16x128xf32> -> vector<16x128xf32>
    %7 = arith.addf %3, %6 : vector<16x128xf32>
    %c0_6 = arith.constant 0 : index
    %c0_7 = arith.constant 0 : index
    %8 = vector.load %arg7[%c0_6, %c0_7] : memref<16x128xf32, #tpu.memory_space<vmem>>, vector<16x128xf32>
    tpu.vector_store %arg7[%c0_6, %c0_7], %7 {strides = array<i32>} : memref<16x128xf32, #tpu.memory_space<vmem>>, vector<16x128xf32>,
    %c0_i32_8 = arith.constant 0 : i32
    %9 = arith.cmpi eq, %arg2, %c0_i32_8 : i32
    %10 = arith.extui %9 : i1 to i32
    %c0_i32_9 = arith.constant 0 : i32
    %11 = arith.cmpi ne, %10, %c0_i32_9 : i32
    scf.if %11 {
      %c0_10 = arith.constant 0 : index
      %c0_11 = arith.constant 0 : index
      %12 = vector.load %arg7[%c0_10, %c0_11] : memref<16x128xf32, #tpu.memory_space<vmem>>, vector<16x128xf32>
      %c0_12 = arith.constant 0 : index
      %c0_13 = arith.constant 0 : index
      %13 = vector.load %arg5[%c0_12, %c0_13] : memref<1x128xf32, #tpu.memory_space<vmem>>, vector<1x128xf32>
      %14 = vector.broadcast %13 : vector<1x128xf32> to vector<16x128xf32>
      %15 = arith.addf %12, %14 : vector<16x128xf32>
      %c0_14 = arith.constant 0 : index
      %c0_15 = arith.constant 0 : index
      %16 = vector.load %arg6[%c0_14, %c0_15] : memref<16x128xf32, #tpu.memory_space<vmem>>, vector<16x128xf32>
      tpu.vector_store %arg6[%c0_14, %c0_15], %15 {strides = array<i32>} : memref<16x128xf32, #tpu.memory_space<vmem>>, vector<16x128xf32>,
    } else {
    }
    return
  }
  func.func @transform_0(%arg0: i32, %arg1: i32, %arg2: i32) -> (i32, i32) {
    %c0_i32 = arith.constant 0 : i32
    return %arg0, %arg2 : i32, i32
  }
  func.func @transform_1(%arg0: i32, %arg1: i32, %arg2: i32) -> (i32, i32) {
    %c0_i32 = arith.constant 0 : i32
    return %arg2, %arg1 : i32, i32
  }
  func.func @transform_2(%arg0: i32, %arg1: i32, %arg2: i32) -> (i32, i32) {
    %c0_i32 = arith.constant 0 : i32
    %c0_i32_0 = arith.constant 0 : i32
    return %c0_i32, %arg1 : i32, i32
  }
  func.func @transform_3(%arg0: i32, %arg1: i32, %arg2: i32) -> (i32, i32) {
    %c0_i32 = arith.constant 0 : i32
    return %arg0, %arg1 : i32, i32
  }
}

</mosaic_0001>

<bundles_post_ra>
// kernel: tpu_custom_call.1
= control target key start
LH: loop header
LB: loop body
LE: loop exit
PB: predicated region body
PF: predicated region fallthrough
CT: control target
= control target key end

     0   :  { %8 = vsyncpa [#allocation4], 0  ;;  %s367_s0 = inlined_call_operand.hbm [shape: bf16[16,128], index: 0, kind: input, shape index: {}]   ;;  %s368_s1 = inlined_call_operand.hbm [shape: bf16[128,128], index: 1, kind: input, shape index: {}]   ;;  %s369_s2 = inlined_call_operand.vmem [shape: f32[1,128], index: 2, kind: input, shape index: {}]   ;;  %s370_s3 = inlined_call_operand.hbm [shape: f32[16,128], index: 3, kind: output, shape index: {}]  }
   0x1   :  { %9 = vsyncpa [#allocation7], 0 }
   0x2   :  { %10 = vsyncpa [#allocation5], 0  ;;  %s326_s12 = smov [#allocation3]  }
   0x3   :  { %s16_s13 = sshll.u32 %s326_s12, 4  ;;  %s17_s13 = int_to_ptr.vmem [resolvable:$true] %s16_s13 }
   0x4   :  { %s268_s14 = scalar_lea.vmem %s17_s13, 128  ;;  %p273_p1 = scmp.lt.s32.totalorder %s17_s13, %s17_s13 }
   0x5   :  { %p269_p0 = scmp.ne.s32.totalorder %s17_s13, %s268_s14  ;;  %p274_p2 = scmp.lt.s32.totalorder %s268_s14, %s268_s14 }
   0x7   :  { %p275_p3 = por %p274_p2, %p273_p1 }
   0x9   :  { %p276_p4 = pnand %p275_p3, %p269_p0 }
   0xb   :  { %279 = shalt.err (!%p276_p4)
}
   0xc   :  { %s327_s15 = smov 64   ;;  %s328_s16 = smov 4  }
   0xd   :  { %22 = dma.hbm_to_vmem [thread:$0]  %s367_s0, 128, %s17_s13, [#allocation4], %s327_s15, %s327_s15, %s328_s16  }
   0xe   :  { %s329_s19 = smov [#allocation6]  }
   0xf   :  { %s28_s20 = sshll.u32 %s329_s19, 4  ;;  %s29_s20 = int_to_ptr.vmem [resolvable:$true] %s28_s20 }
  0x10   :  { %s288_s21 = scalar_lea.vmem %s29_s20, 1024  ;;  %p293_p6 = scmp.lt.s32.totalorder %s29_s20, %s29_s20 }
  0x11   :  { %p289_p5 = scmp.ne.s32.totalorder %s29_s20, %s288_s21  ;;  %p294_p7 = scmp.lt.s32.totalorder %s288_s21, %s288_s21 }
  0x13   :  { %p295_p8 = por %p294_p7, %p293_p6 }
  0x15   :  { %p296_p9 = pnand %p295_p8, %p289_p5 }
  0x17   :  { %299 = shalt.err (!%p296_p9)
}
  0x18   :  { %34 = dma.hbm_to_vmem [thread:$0]  %s368_s1, 1024, %s29_s20, [#allocation7], %s327_s15, %s327_s15, %s328_s16  }
  0x19   :  { %320 = dma.done.wait [#allocation4], 128  }
  0x1a   :  { %321 = vsyncadd [#allocation4], 4294967168 }
  0x1b   :  { %322 = dma.done.wait [#allocation7], 1024  }
  0x1c   :  { %323 = vsyncadd [#allocation7], 4294966272  ;;  %v330_v0 = vmov 0.0   ;;  %vm331_vm0 = vmmov 0   ;;  %v251_v1 = vld [vmem:[#allocation6 + $0x38] sm:$0xff]   ;;  %v252_v2 = vld [vmem:[#allocation6 + $0x30] sm:$0xff]  }
  0x1d   :  { %222 = vmatprep.subr.bf16.mxu0 %v330_v0  ;;  %238 = vmatprep.mubr.msk.bf16.mxu0 %vm331_vm0, %v330_v0  ;;  %v253_v3 = vld [vmem:[#allocation6 + $0x28] sm:$0xff]   ;;  %v254_v4 = vld [vmem:[#allocation6 + $0x20] sm:$0xff]   ;;  %v255_v5 = vld [vmem:[#allocation6 + $0x18] sm:$0xff]   ;;  %s332_s24 = smov [#allocation8]  }
  0x1e   :  { %223 = vmatpush3.bf16.msra.mxu0 %v251_v1  ;;  %v256_v6 = vld [vmem:[#allocation6 + $0x10] sm:$0xff]   ;;  %v257_v7 = vld [vmem:[#allocation6 + $0x8] sm:$0xff]   ;;  %v258_v8 = vld [vmem:[#allocation6] sm:$0xff]   ;;  %s190_s25 = sshll.u32 %s332_s24, 4  ;;  %s191_s25 = int_to_ptr.vmem [resolvable:$true] %s190_s25 }
  0x1f   :  { %224 = vmatprep.subr.bf16.mxu0 %v330_v0  ;;  %v259_v9 = vld [vmem:[#allocation3] sm:$0xff]   ;;  %s300_s26 = scalar_lea.vmem %s191_s25, 256  ;;  %p305_p11 = scmp.lt.s32.totalorder %s191_s25, %s191_s25 }
  0x20   :  { %v212_v10 = vld [vmem:[%s369_s2] ss:$0 sm:$0xff]  ;;  %p301_p10 = scmp.ne.s32.totalorder %s191_s25, %s300_s26  ;;  %p306_p12 = scmp.lt.s32.totalorder %s300_s26, %s300_s26 }
  0x22   :  { %225 = vmatpush3.bf16.msra.mxu0 %v252_v2  ;;  %p307_p13 = por %p306_p12, %p305_p11 }
  0x23   :  { %226 = vmatprep.subr.bf16.mxu0 %v330_v0 }
  0x24   :  { %p308_p0 = pnand %p307_p13, %p301_p10 }
  0x26   :  { %227 = vmatpush3.bf16.msra.mxu0 %v253_v3 }
  0x27   :  { %228 = vmatprep.subr.bf16.mxu0 %v330_v0 }
  0x2a   :  { %229 = vmatpush3.bf16.msra.mxu0 %v254_v4 }
  0x2b   :  { %230 = vmatprep.subr.bf16.mxu0 %v330_v0 }
  0x2e   :  { %231 = vmatpush3.bf16.msra.mxu0 %v255_v5 }
  0x2f   :  { %232 = vmatprep.subr.bf16.mxu0 %v330_v0 }
  0x32   :  { %233 = vmatpush3.bf16.msra.mxu0 %v256_v6 }
  0x33   :  { %234 = vmatprep.subr.bf16.mxu0 %v330_v0 }
  0x36   :  { %235 = vmatpush3.bf16.msra.mxu0 %v257_v7 }
  0x37   :  { %236 = vmatprep.subr.bf16.mxu0 %v330_v0 }
  0x3a   :  { %237 = vmatpush3.bf16.msra.mxu0 %v258_v8 }
  0x3d   :  { %239 = vmatmul.mubr.bf16.vlgmr.msra.gmra.mxu0 %v259_v9 }
  0xfd   :  { %v158_v11 = vpop.f32.mrf.mxu0 }
  0xfe   :  { %v181_v12 = vadd.f32 %v212_v10, %v158_v11 }
  0xff   :  { %v240_v13 = vpop.f32.mrf.mxu0 }
 0x100   :  { %183 = vst [vmem:[#allocation8] sm:$0xff] %v181_v12 }
 0x101   :  { %v161_v14 = vpop.f32.mrf.mxu0 }
 0x102   :  { %v182_v15 = vadd.f32 %v212_v10, %v161_v14 }
 0x103   :  { %v241_v16 = vpop.f32.mrf.mxu0 }
 0x104   :  { %184 = vst [vmem:[#allocation8 + $0x8] sm:$0xff] %v182_v15 }
 0x105   :  { %311 = shalt.err (!%p308_p0)
}
 0x106   :  { %s333_s27 = smov 128   ;;  %s334_s2 = smov 8  }
 0x107   :  { %196 = dma.vmem_to_hbm [thread:$0]  %s191_s25, 256, %s370_s3, [#allocation5], %s333_s27, %s333_s27, %s334_s2  }
 0x108   :  { %324 = dma.done.wait [#allocation5], 256  }
 0x109   :  { %325 = vsyncadd [#allocation5], 4294967040 }
 0x10a   :  { %200 = vsyncpa [#allocation4], 1 }
 0x10b   :  { %201 = vsyncpa [#allocation7], 1 }
 0x10c   :  { %202 = vsyncpa [#allocation5], 1 }

</bundles_post_ra>
